<compile_context>
chip_gen: v7x
topology: tpu7x:2x2x1
jax: 0.10.0
libtpu: 0.0.40
codegen_flags: <defaults>
</compile_context>

<pallas_src>
import jax
import jax.numpy as jnp
from jax import lax
from jax.experimental import pallas as pl
from jax.experimental.pallas import tpu as pltpu


def _round_up(x, m):
    return ((x + m - 1) // m) * m


def _pick_tile_h(H):
    # Chunk the hidden dim so the table streams through VMEM (DMA/compute
    # overlap); keep the full dim when it is small or has no nice divisor.
    if H <= 1024:
        return H
    for t in (1024, 768, 512, 384, 256, 128):
        if H % t == 0:
            return t
    return H


def _label_embed_onehot_kernel(ids_ref, table_ref, out_ref):
    # ids_ref   : VMEM (block_b, 1) int32 -- effective row ids (drop applied)
    # table_ref : VMEM (V, tile_h)        -- current hidden-dim chunk of table
    # out_ref   : VMEM (block_b, tile_h)  -- output tile
    ids = ids_ref[...]                                   # (block_b, 1)
    block_b = ids.shape[0]
    V = table_ref.shape[0]

    col = lax.broadcasted_iota(jnp.int32, (block_b, V), 1)
    # 32-bit compare + select (v5e's VPU has no bf16 path); cast only at the dot.
    one_hot = jnp.where(col == ids, 1.0, 0.0).astype(table_ref.dtype)

    out = jnp.dot(one_hot, table_ref[...], preferred_element_type=jnp.float32)
    out_ref[...] = out.astype(out_ref.dtype)


def label_embedding_forward(labels, force_drop_ids, embedding_table,
                            num_classes, *, block_b=None, tile_h=None):
    """Equivalent of LabelEmbedding.forward(labels, force_drop_ids)."""
    B = labels.shape[0]
    V, H = embedding_table.shape
    out_dtype = embedding_table.dtype
    itemsize = jnp.dtype(out_dtype).itemsize

    labels = labels.astype(jnp.int32)
    if force_drop_ids is not None:
        ids = jnp.where(force_drop_ids.astype(jnp.int32) == 1,
                        jnp.int32(num_classes), labels)
    else:
        ids = labels
    # Clamp guards OOB rows (dropout_prob == 0 => no CFG row; bad labels).
    # NOTE: PyTorch would raise here instead of clamping.
    ids = jnp.clip(ids, 0, V - 1)

    # Min sublane tile depends on output dtype: 8 (4B), 16 (2B), 32 (1B).
    sub = {4: 8, 2: 16, 1: 32}.get(itemsize, 8)
    if block_b is None:
        block_b = min(_round_up(B, sub), 256)    # 256 is a multiple of 8/16/32
    else:
        block_b = _round_up(block_b, sub)
    B_pad = _round_up(B, block_b)

    # Padded rows gather table row 0 and are sliced off below.
    ids = jnp.pad(ids, (0, B_pad - B))[:, None]  # (B_pad, 1) int32, VMEM input

    if tile_h is None:
        tile_h = _pick_tile_h(H)
    grid = (H // tile_h, B_pad // block_b)       # h outer, batch inner:
    #  -> the table chunk index is constant across inner batch steps (reused),
    #     and each output tile is written exactly once.

    # Explicit VMEM budget (table chunk + out tile double-buffered, ids tile,
    # plus headroom for the one-hot operand).  When the grid collapses to a
    # single table block the second pipeline buffer is idle waste, but the
    # H-chunking above already caps it at 2*V*tile_h bytes.
    need = (2 * V * tile_h * itemsize
            + 2 * block_b * tile_h * itemsize
            + 2 * block_b * 4
            + 4 * block_b * V              # one-hot operand (f32)
            + (4 << 20))                   # headroom
    vmem_limit = int(min(64 * 2 ** 20, max(16 * 2 ** 20, need)))

    out = pl.pallas_call(
        _label_embed_onehot_kernel,
        out_shape=jax.ShapeDtypeStruct((B_pad, H), out_dtype),
        grid_spec=pltpu.PrefetchScalarGridSpec(
            num_scalar_prefetch=0,
            grid=grid,
            in_specs=[
                pl.BlockSpec((block_b, 1), lambda h, b: (b, 0)),   # ids
                pl.BlockSpec((V, tile_h), lambda h, b: (0, h)),    # table chunk
            ],
            out_specs=pl.BlockSpec((block_b, tile_h), lambda h, b: (b, h)),
        ),
        compiler_params=pltpu.CompilerParams(
            # "arbitrary": do not shard the batch axis across v7x TensorCores —
            # that would duplicate the dominant table DMA for no compute win.
            dimension_semantics=("arbitrary", "arbitrary"),
            vmem_limit_bytes=vmem_limit,
        ),
    )(ids, embedding_table)

    return out[:B]  # drop padded rows (do not remove)


def label_embedding_forward_train(labels, embedding_table, num_classes,
                                  dropout_prob, rng_key, **kw):
    """Training-mode stochastic label dropout (RNG in plain JAX), then the
    same Pallas gather kernel."""
    # TODO(synk): drop pattern uses jax.random, so it will not bit-match torch.rand.
    drop_ids = (jax.random.uniform(rng_key, (labels.shape[0],)) < dropout_prob)
    return label_embedding_forward(labels, drop_ids.astype(jnp.int32),
                                   embedding_table, num_classes, **kw)


if __name__ == "__main__":
    num_classes = 10
    hidden_size = 128
    dropout_prob = 0.1          # > 0  =>  CFG embedding row is appended
    batch = 8

    key = jax.random.PRNGKey(0)
    k_tab, k_lab, k_drop = jax.random.split(key, 3)

    use_cfg_embedding = 1 if dropout_prob > 0 else 0
    table_f32 = jax.random.normal(
        k_tab, (num_classes + use_cfg_embedding, hidden_size), dtype=jnp.float32)
    table_bf16 = table_f32.astype(jnp.bfloat16)

    labels = jax.random.randint(k_lab, (batch,), 0, num_classes, dtype=jnp.int32)
    force_drop_ids = (jax.random.uniform(k_drop, (batch,)) < 0.5).astype(jnp.int32)
    dropped = jnp.where(force_drop_ids == 1, num_classes, labels)

    # --- bf16 table (recommended deployment dtype): gather must be bit-exact ---
    out_bf16 = jax.block_until_ready(
        label_embedding_forward(labels, force_drop_ids, table_bf16, num_classes))
    ref_bf16 = table_bf16[dropped]
    assert out_bf16.shape == (batch, hidden_size)
    assert out_bf16.dtype == jnp.bfloat16
    assert jnp.array_equal(out_bf16, ref_bf16), "bf16 one-hot gather mismatch"

    # --- f32 table (Mosaic f32 matmul is ~full precision; tolerance also covers
    #     a bf16-pass fallback, whose error would be < 2^-8 relative) ---
    out_f32 = jax.block_until_ready(
        label_embedding_forward(labels, force_drop_ids, table_f32, num_classes))
    ref_f32 = table_f32[dropped]
    assert out_f32.shape == (batch, hidden_size)
    assert jnp.allclose(out_f32, ref_f32, rtol=5e-3, atol=5e-3), \
        "f32 one-hot gather mismatch"

    # --- ragged batch + inference (force_drop_ids=None) path ---
    b2 = 6
    out2 = jax.block_until_ready(
        label_embedding_forward(labels[:b2], None, table_bf16, num_classes))
    assert out2.shape == (b2, hidden_size)
    assert jnp.array_equal(out2, table_bf16[labels[:b2]]), "no-drop path mismatch"

    print("KERNEL_OK")
</pallas_src>

<mosaic_0001>
module attributes {stable_mosaic.version = 11 : i64} {
  func.func @_label_embed_onehot_kernel(%arg0: i32, %arg1: i32, %arg2: memref<16x1xi32, #tpu.memory_space<vmem>>, %arg3: memref<11x128xbf16, #tpu.memory_space<vmem>>, %arg4: memref<16x128xbf16, #tpu.memory_space<vmem>>) attributes {dimension_semantics = [#tpu.dimension_semantics<arbitrary>, #tpu.dimension_semantics<arbitrary>], iteration_bounds = array<i64: 1, 1>, scalar_prefetch = 0 : i64, scratch_operands = 0 : i64, tpu.core_type = #tpu.core_type<tc>, window_params = [{transform_indices = @transform_0, window_bounds = array<i64: 16, 1>}, {transform_indices = @transform_1, window_bounds = array<i64: 11, 128>}, {transform_indices = @transform_2, window_bounds = array<i64: 16, 128>}]} {
    %c0 = arith.constant 0 : index
    %c0_0 = arith.constant 0 : index
    %0 = vector.load %arg2[%c0, %c0_0] : memref<16x1xi32, #tpu.memory_space<vmem>>, vector<16x1xi32>
    %1 = tpu.iota {dimensions = array<i32: 1>} : vector<16x11xi32>
    %2 = vector.broadcast %0 : vector<16x1xi32> to vector<16x11xi32>
    %3 = arith.cmpi eq, %1, %2 : vector<16x11xi32>
    %cst = arith.constant 1.000000e+00 : f32
    %cst_1 = arith.constant 0.000000e+00 : f32
    %4 = vector.broadcast %cst : f32 to vector<16x11xf32>
    %5 = vector.broadcast %cst_1 : f32 to vector<16x11xf32>
    %6 = arith.select %3, %4, %5 : vector<16x11xi1>, vector<16x11xf32>
    %7 = arith.truncf %6 : vector<16x11xf32> to vector<16x11xbf16>
    %c0_2 = arith.constant 0 : index
    %c0_3 = arith.constant 0 : index
    %8 = vector.load %arg3[%c0_2, %c0_3] : memref<11x128xbf16, #tpu.memory_space<vmem>>, vector<11x128xbf16>
    %cst_4 = arith.constant dense<0.000000e+00> : vector<16x128xf32>
    %9 = tpu.matmul %7, %8, %cst_4 {dimension_numbers = #tpu.dot_dimension_numbers<[1], [0], [0], [1], [0, 0, 1, 1], [], []>} : vector<16x11xbf16>, vector<11x128xbf16>, vector<16x128xf32> -> vector<16x128xf32>
    %10 = arith.truncf %9 : vector<16x128xf32> to vector<16x128xbf16>
    %c0_5 = arith.constant 0 : index
    %c0_6 = arith.constant 0 : index
    %11 = vector.load %arg4[%c0_5, %c0_6] : memref<16x128xbf16, #tpu.memory_space<vmem>>, vector<16x128xbf16>
    tpu.vector_store %arg4[%c0_5, %c0_6], %10 {strides = array<i32>} : memref<16x128xbf16, #tpu.memory_space<vmem>>, vector<16x128xbf16>,
    return
  }
  func.func @transform_0(%arg0: i32, %arg1: i32) -> (i32, i32) {
    %c0_i32 = arith.constant 0 : i32
    %c0_i32_0 = arith.constant 0 : i32
    return %arg1, %c0_i32 : i32, i32
  }
  func.func @transform_1(%arg0: i32, %arg1: i32) -> (i32, i32) {
    %c0_i32 = arith.constant 0 : i32
    %c0_i32_0 = arith.constant 0 : i32
    return %c0_i32, %arg0 : i32, i32
  }
  func.func @transform_2(%arg0: i32, %arg1: i32) -> (i32, i32) {
    %c0_i32 = arith.constant 0 : i32
    return %arg1, %arg0 : i32, i32
  }
}

</mosaic_0001>

<bundles_post_ra>
// kernel: tpu_custom_call.1
= control target key start
LH: loop header
LB: loop body
LE: loop exit
PB: predicated region body
PF: predicated region fallthrough
CT: control target
= control target key end

     0   :  { %v165_v1 = vmov 0   ;;  %v166_v2 = vmov 0.0   ;;  %s208_s0 = inlined_call_operand.vmem [shape: s32[16,1], index: 0, kind: input, shape index: {}]   ;;  %s209_s1 = inlined_call_operand.vmem [shape: bf16[11,128], index: 1, kind: input, shape index: {}]   ;;  %s210_s2 = inlined_call_operand.hbm [shape: bf16[16,128], index: 2, kind: output, shape index: {}]  }
   0x1   :  { %v13_v0 = vld [vmem:[%s208_s0] sm:$0xff]  ;;  %139 = vset.pattern.permute.xlu0 %v165_v1  ;;  %126 = vmatprep.subr.bf16.mxu0 %v166_v2 }
   0x2   :  { %7 = vsyncpa [#allocation3], 0  ;;  %18 = vperm.xlu0 %139, %v13_v0   ;;  %vm39_vm0 = vcmask 1044480   ;;  %v14_v3 = vld [vmem:[%s208_s0 + $0x8] sm:$0xff]  ;;  %v140_v4 = vld [vmem:[%s209_s1] sm:$0x3f]   ;;  %v15_v9 = vlaneseq }
   0x3   :  { %vm40_vm1 = vcmask 1045504   ;;  %v167_v5 = vmov 65535   ;;  %vm168_vm2 = vmmov 0   ;;  %vm35_vm5 = vcmask 89088   ;;  %s169_s0 = smov [#allocation2]  }
   0x4   :  { %v41_v6 = vsel %vm39_vm0, 4294967295, %v167_v5  ;;  %128 = vmatprep.mubr.msk.bf16.mxu0 %vm168_vm2, %v166_v2  ;;  %v16_v10 = vand.u32 127, %v15_v9  ;;  %s102_s1 = sshll.u32 %s169_s0, 4  ;;  %s103_s1 = int_to_ptr.vmem [resolvable:$true] %s102_s1 }
   0x5   :  { %v42_v7 = vsel %vm40_vm1, %v41_v6, 0  ;;  %s141_s15 = scalar_lea.vmem %s103_s1, 128  ;;  %p146_p1 = scmp.lt.s32.totalorder %s103_s1, %s103_s1 }
   0x6   :  { %v44_v8 = vand.u32 %v140_v4, %v42_v7  ;;  %21 = vperm.xlu0 %139, %v14_v3   ;;  %p142_p0 = scmp.ne.s32.totalorder %s103_s1, %s141_s15  ;;  %p147_p2 = scmp.lt.s32.totalorder %s141_s15, %s141_s15 }
   0x8   :  { %127 = vmatpush3.bf16.msra.mxu0 %v44_v8  ;;  %p148_p3 = por %p147_p2, %p146_p1 }
   0xa   :  { %p149_p4 = pnand %p148_p3, %p142_p0 }
  0x81   :  { %v19_v11 = vpop.permute.xlu0 %18 }
  0x82   :  { %vm23_vm3 = vcmp.eq.s32.totalorder %v16_v10, %v19_v11 }
  0x83   :  { %v25_v13 = vsel %vm23_vm3, 1.0, %v166_v2 }
  0x85   :  { %v22_v12 = vpop.permute.xlu0 %21 }
  0x86   :  { %vm24_vm4 = vcmp.eq.s32.totalorder %v16_v10, %v22_v12 }
  0x87   :  { %v26_v14 = vsel %vm24_vm4, 1.0, %v166_v2 }
  0x88   :  { %v27_v15 = vpack.c.bf16 %v26_v14, %v25_v13 }
  0x8a   :  { %129 = vmatmul.mubr.msk.bf16.vlgmr.msra.gmra.mrb[0].mxu0 %vm35_vm5, %v27_v15 }
 0x15d   :  { %v80_v16 = vpop.f32.mrb[0].mxu0 }
 0x15e   :  { %v130_v17 = vpop.f32.mrb[1].mxu0 }
 0x15f   :  { %v83_v18 = vpop.f32.mrb[2].mxu0 }
 0x160   :  { %v122_v19 = vpack.c.bf16 %v83_v18, %v80_v16  ;;  %v131_v20 = vpop.f32.mrb[3].mxu0 }
 0x162   :  { %123 = vst [vmem:[#allocation2] sm:$0xff] %v122_v19  }
 0x163   :  { %152 = shalt.err (!%p149_p4)
}
 0x164   :  { %s153_s18 = scalar_lea.hbm %s210_s2, 128 }
 0x165   :  { %p154_p5 = scmp.ne.s32.totalorder %s210_s2, %s153_s18  ;;  %p157_p6 = scmp.lt.u32.totalorder %s153_s18, %s210_s2 }
 0x167   :  { %p159_p7 = pnand %p157_p6, %p154_p5 }
 0x169   :  { %162 = shalt.err (!%p159_p7)
}
 0x16a   :  { %s170_s23 = smov 64   ;;  %s171_s24 = smov 4  }
 0x16b   :  { %108 = dma.vmem_to_hbm [thread:$0]  %s103_s1, 128, %s210_s2, [#allocation3], %s170_s23, %s170_s23, %s171_s24  }
 0x16c   :  { %163 = dma.done.wait [#allocation3], 128  }
 0x16d   :  { %164 = vsyncadd [#allocation3], 4294967168 }
 0x16e   :  { %112 = vsyncpa [#allocation3], 1 }

</bundles_post_ra>
